<compile_context>
chip_gen: v7x
topology: tpu7x:2x2x1
jax: 0.10.0
libtpu: 0.0.40
codegen_flags: <defaults>
</compile_context>

<pallas_src>
import functools
import math

import jax
import jax.numpy as jnp
from jax.experimental import pallas as pl
from jax.experimental.pallas import tpu as pltpu


# severity -> (radius, sigma), exactly as in the PyTorch module
_SEV_TABLE = [(10, 3), (15, 5), (15, 8), (15, 12), (20, 15)]


def _build_line_taps(severity: int, angle_deg: float):
    """Static (oy, ox, weight) taps of the motion-blur line kernel.

    Mirrors ImageMagick's motion blur: a one-sided line of `radius + 1`
    Gaussian-weighted samples in direction `angle`, normalized to sum 1.
    Offsets are rounded to integer pixels (co-located taps are merged).
    """
    radius, sigma = _SEV_TABLE[severity - 1]
    n_taps = int(radius) + 1
    theta = math.radians(angle_deg)
    cos_t, sin_t = math.cos(theta), math.sin(theta)

    acc = {}
    total = 0.0
    for i in range(n_taps):
        w = math.exp(-(i * i) / (2.0 * sigma * sigma))
        oy = int(round(i * sin_t))
        ox = int(round(i * cos_t))
        acc[(oy, ox)] = acc.get((oy, ox), 0.0) + w
        total += w
    return [(oy, ox, w / total) for (oy, ox), w in sorted(acc.items())]


def _group_taps(severity: int, angle_deg: float):
    """Taps grouped by horizontal offset `ox`, plus halo extents."""
    taps = _build_line_taps(severity, angle_deg)
    oys = [t[0] for t in taps]
    oxs = [t[1] for t in taps]
    pad_top, pad_bot = max(0, -min(oys)), max(0, max(oys))
    ex_left, ex_right = max(0, -min(oxs)), max(0, max(oxs))
    groups = {}
    for oy, ox, w in taps:
        groups.setdefault(ox, []).append((oy, w))
    ox_groups = tuple(sorted((ox, tuple(sorted(g))) for ox, g in groups.items()))
    return taps, ox_groups, pad_top, pad_bot, ex_left, ex_right


def _round_up(a: int, b: int) -> int:
    return -(-a // b) * b


def _vmem_params():
    """Per-grid-step working-set budget and scoped-VMEM limit, derived from the
    local chip so the same code sizes itself for v5e/v6e (128 MiB VMEM) and
    v7x (64 MiB per TensorCore)."""
    try:
        cap = int(pltpu.get_tpu_info().vmem_capacity_bytes)
    except Exception:  # no queryable TPU at trace time -> conservative default
        cap = 64 * 1024 * 1024
    step_budget = max(6 * 1024 * 1024, min(cap // 6, 24 * 1024 * 1024))
    vmem_limit = min(cap * 3 // 4, 96 * 1024 * 1024)
    return step_budget, vmem_limit


def _choose_packed_nb(N, H, W, extra_cols, itemsize, budget):
    """Frames per grid step for the lane-packed path (W < 128).

    The block lane extent NB*W must be a multiple of 128 (the (8,128) tiling
    rule), so NB is a multiple of 128/gcd(W,128); the wrapper zero-pads the
    frame count up to a multiple of NB.  NB grows while the per-step working
    set fits the budget but stays small enough to leave >= 2 grid steps
    (DMA/compute overlap, megacore) whenever there is more than one granule."""
    g = 128 // math.gcd(W, 128)

    def est(nb):
        nbw = nb * W
        io = 4 * H * nbw * itemsize                  # 2x-buffered in + out blocks
        work = 6 * (H + 8) * (nbw + extra_cols) * 4  # padded value + group temps + acc
        return io + work

    nb = g
    while est(nb + g) <= budget and 2 * (nb + g) <= _round_up(N, g):
        nb += g
    return nb, _round_up(N, nb)


def _choose_native_nb(N, H, W, extra_cols, n_groups, itemsize, budget):
    """Frames per grid step for the native (W >= 128) path: the largest NB <= 8
    dividing N that fits the budget and leaves >= 2 grid steps, preferring an
    even number of steps (balanced megacore sharding on v7x)."""
    def est(nb):
        io = 4 * nb * H * W * itemsize               # 2x-buffered in + out blocks
        wm = 2 * n_groups * H * H * 4                # resident banded-weight input
        work = 4 * H * (W + extra_cols) * 4          # per-frame value temporaries
        return io + wm + work

    valid = [c for c in range(1, min(N, 8) + 1) if N % c == 0 and est(c) <= budget]
    if not valid:
        return 1
    multi = [c for c in valid if N // c >= 2]
    even = [c for c in multi if (N // c) % 2 == 0]
    pool = even or multi or valid
    return max(pool)


# --------------------------------------------------------------------------
# Kernels
# --------------------------------------------------------------------------

def _mb_kernel_packed(x_ref, o_ref, *, ox_groups, H, W, NBW,
                      pad_top, pad_bot, ex_left, ex_right):
    """VPU path (W < 128): frames packed along lanes; taps grouped by ox."""
    f32 = jnp.float32
    Hp = H + pad_top + pad_bot

    x = x_ref[...].astype(f32)                                      # (H, NBW)

    # Zero halo built as a VALUE -- no scratch store/reload, no write-then-read
    # dependency, no VMEM scratch allocation.
    rows = ([jnp.zeros((pad_top, NBW), f32)] if pad_top else []) + [x] + \
           ([jnp.zeros((pad_bot, NBW), f32)] if pad_bot else [])
    xv = jnp.concatenate(rows, axis=0) if len(rows) > 1 else x      # (Hp, NBW)
    cols = ([jnp.zeros((Hp, ex_left), f32)] if ex_left else []) + [xv] + \
           ([jnp.zeros((Hp, ex_right), f32)] if ex_right else [])
    xp = jnp.concatenate(cols, axis=1) if len(cols) > 1 else xv     # (Hp, Wt)

    # Per-lane column index within its frame (frames are W lanes wide); used to
    # zero group contributions that would cross a frame boundary.
    col = None
    if any(ox != 0 for ox, _ in ox_groups):
        col = jax.lax.broadcasted_iota(jnp.int32, (H, NBW), 1) % W

    acc = None
    for ox, oy_taps in ox_groups:
        # One lane shift per distinct horizontal offset.
        src = xp[:, ex_left + ox: ex_left + ox + NBW]               # (Hp, NBW)
        gsum = None
        for oy, wt in oy_taps:                                      # sublane slices
            r0 = pad_top + oy
            term = f32(wt) * src[r0:r0 + H, :]
            gsum = term if gsum is None else gsum + term
        # Frame-border mask applied once to the (H, NBW) group partial sum.
        if ox > 0:
            gsum = jnp.where(col < (W - ox), gsum, 0.0)
        elif ox < 0:
            gsum = jnp.where(col >= (-ox), gsum, 0.0)
        acc = gsum if acc is None else acc + gsum

    # Normalized non-negative weights + ToTensor [0,1] inputs => result already
    # in [0,1]; the reference's clip is a provable no-op (dropped).
    o_ref[...] = acc.astype(o_ref.dtype)


def _mb_kernel_native(x_ref, wm_ref, o_ref, *, ox_groups, H, W, NB,
                      ex_left, ex_right):
    """MXU path (W >= 128): per distinct ox a banded (H, H) weight matrix
    contracts the row (sublane) axis of the horizontally shifted frame."""
    f32 = jnp.float32
    for n in range(NB):                                             # unrolled
        x = x_ref[n].astype(f32)                                    # (H, W)
        cols = ([jnp.zeros((H, ex_left), f32)] if ex_left else []) + [x] + \
               ([jnp.zeros((H, ex_right), f32)] if ex_right else [])
        xh = jnp.concatenate(cols, axis=1) if len(cols) > 1 else x  # (H, Wt)
        acc = None
        for g, (ox, _) in enumerate(ox_groups):
            src = xh[:, ex_left + ox: ex_left + ox + W]             # (H, W)
            term = jnp.dot(wm_ref[g], src, preferred_element_type=f32)
            acc = term if acc is None else acc + term
        o_ref[n] = acc.astype(o_ref.dtype)


# --------------------------------------------------------------------------
# Wrappers
# --------------------------------------------------------------------------

def _motion_blur_packed(frames, ox_groups, pad_top, pad_bot, ex_left, ex_right,
                        budget, vmem_limit):
    C, T, H, W = frames.shape
    N = C * T

    NB, Npad = _choose_packed_nb(N, H, W, ex_left + ex_right,
                                 jnp.dtype(frames.dtype).itemsize, budget)
    NBW = NB * W

    x = frames.reshape(N, H, W)
    if Npad != N:
        x = jnp.concatenate([x, jnp.zeros((Npad - N, H, W), frames.dtype)], axis=0)
    # Lane-dense packing (layout plumbing, small-frame fallback only): each
    # frame owns a contiguous W-lane segment of the (H, Npad*W) slab.
    packed = x.transpose(1, 0, 2).reshape(H, Npad * W)

    kernel = functools.partial(
        _mb_kernel_packed, ox_groups=ox_groups, H=H, W=W, NBW=NBW,
        pad_top=pad_top, pad_bot=pad_bot, ex_left=ex_left, ex_right=ex_right)

    out_packed = pl.pallas_call(
        kernel,
        out_shape=jax.ShapeDtypeStruct((H, Npad * W), frames.dtype),
        grid=(Npad // NB,),
        in_specs=[pl.BlockSpec((H, NBW), lambda i: (0, i))],
        out_specs=pl.BlockSpec((H, NBW), lambda i: (0, i)),
        compiler_params=pltpu.CompilerParams(
            dimension_semantics=("parallel",),
            vmem_limit_bytes=vmem_limit),
    )(packed)

    out = out_packed.reshape(H, Npad, W).transpose(1, 0, 2)[:N]
    return out.reshape(C, T, H, W)


def _motion_blur_native(frames, ox_groups, ex_left, ex_right, budget, vmem_limit):
    C, T, H, W = frames.shape
    N = C * T
    G = len(ox_groups)

    # Constant banded weight matrices: wm[g][h, h + oy] = tap weight; rows whose
    # source index falls outside [0, H) are simply absent (zero padding), so no
    # vertical halo is materialized at all.
    wm = jnp.stack([
        sum(jnp.float32(wt) * jnp.eye(H, k=oy, dtype=jnp.float32)
            for oy, wt in oy_taps)
        for _, oy_taps in ox_groups])                               # (G, H, H)

    NB = _choose_native_nb(N, H, W, ex_left + ex_right, G,
                           jnp.dtype(frames.dtype).itemsize, budget)

    kernel = functools.partial(
        _mb_kernel_native, ox_groups=ox_groups, H=H, W=W, NB=NB,
        ex_left=ex_left, ex_right=ex_right)

    out = pl.pallas_call(
        kernel,
        out_shape=jax.ShapeDtypeStruct((N, H, W), frames.dtype),
        grid=(N // NB,),
        in_specs=[pl.BlockSpec((NB, H, W), lambda i: (i, 0, 0)),
                  # Constant block index across the grid -> stays VMEM-resident.
                  pl.BlockSpec((G, H, H), lambda i: (0, 0, 0))],
        out_specs=pl.BlockSpec((NB, H, W), lambda i: (i, 0, 0)),
        compiler_params=pltpu.CompilerParams(
            dimension_semantics=("parallel",),
            vmem_limit_bytes=vmem_limit),
    )(frames.reshape(N, H, W), wm)

    return out.reshape(C, T, H, W)


def motion_blur(frames: jax.Array, severity: int = 1,
                angle_deg: float = 22.5) -> jax.Array:
    """Pallas equivalent of MotionBlur.forward on a (C, T, H, W) float tensor
    (ToTensor-normalized values in [0, 1]).  `angle_deg` is the deterministic
    stand-in for the module's per-call np.random.uniform(-45, 45) draw."""
    if not 1 <= severity <= len(_SEV_TABLE):
        raise ValueError(f"severity must be in [1, {len(_SEV_TABLE)}]")
    _, ox_groups, pad_top, pad_bot, ex_left, ex_right = _group_taps(
        severity, angle_deg)
    budget, vmem_limit = _vmem_params()
    C, T, H, W = frames.shape
    if W >= 128:
        # Production frames: natural layout, MXU accumulation, no packing.
        return _motion_blur_native(frames, ox_groups, ex_left, ex_right,
                                   budget, vmem_limit)
    # Small frames: lane-packed fallback with the VPU tap loop.
    return _motion_blur_packed(frames, ox_groups, pad_top, pad_bot,
                               ex_left, ex_right, budget, vmem_limit)


# --------------------------------------------------------------------------
# Pure-JAX reference and self-test
# --------------------------------------------------------------------------

def _motion_blur_reference(frames: jax.Array, taps) -> jax.Array:
    """Straightforward pure-JAX depthwise line blur (same taps, zero padding)."""
    C, T, H, W = frames.shape
    oys = [t[0] for t in taps]
    oxs = [t[1] for t in taps]
    pt, pb = max(0, -min(oys)), max(0, max(oys))
    pleft, pright = max(0, -min(oxs)), max(0, max(oxs))
    xp = jnp.pad(frames.astype(jnp.float32),
                 ((0, 0), (0, 0), (pt, pb), (pleft, pright)))
    out = jnp.zeros((C, T, H, W), jnp.float32)
    for oy, ox, w in taps:
        out = out + w * xp[:, :, pt + oy:pt + oy + H, pleft + ox:pleft + ox + W]
    return jnp.clip(out, 0.0, 1.0).astype(frames.dtype)


if __name__ == "__main__":
    key = jax.random.PRNGKey(0)
    k_img, k_ang, k_img2 = jax.random.split(key, 3)

    # Deterministic stand-in for np.random.uniform(-45, 45) in the original.
    angle_deg = float(jax.random.uniform(k_ang, (), minval=-45.0, maxval=45.0))

    mb = jax.jit(motion_blur, static_argnames=("severity", "angle_deg"))

    # --- Lane-packed (VPU) fallback path: small 16x16 frames, severity 1 ---
    C, T, H, W = 3, 4, 16, 16
    frames = jax.random.uniform(k_img, (C, T, H, W), dtype=jnp.float32)
    out = jax.block_until_ready(mb(frames, severity=1, angle_deg=angle_deg))
    assert out.shape == frames.shape and out.dtype == frames.dtype
    assert bool(jnp.all(jnp.isfinite(out)))
    ref = _motion_blur_reference(frames, _build_line_taps(1, angle_deg))
    max_err = float(jnp.max(jnp.abs(out - ref)))
    assert max_err < 1e-5, max_err

    # --- Native (MXU) path: W >= 128, severity 3 ---
    C2, T2, H2, W2 = 1, 2, 16, 128
    frames2 = jax.random.uniform(k_img2, (C2, T2, H2, W2), dtype=jnp.float32)
    out2 = jax.block_until_ready(mb(frames2, severity=3, angle_deg=angle_deg))
    assert out2.shape == frames2.shape and out2.dtype == frames2.dtype
    assert bool(jnp.all(jnp.isfinite(out2)))
    ref2 = _motion_blur_reference(frames2, _build_line_taps(3, angle_deg))
    # Looser tolerance: the MXU f32 matmul may be performed with bf16 passes.
    max_err2 = float(jnp.max(jnp.abs(out2 - ref2)))
    assert max_err2 < 5e-3, max_err2

    print("KERNEL_OK")
</pallas_src>

<mosaic_0001>
module attributes {stable_mosaic.version = 11 : i64} {
  func.func @_mb_kernel_packed(%arg0: i32, %arg1: memref<16x128xf32, #tpu.memory_space<vmem>>, %arg2: memref<16x128xf32, #tpu.memory_space<vmem>>) attributes {dimension_semantics = [#tpu.dimension_semantics<parallel>], iteration_bounds = array<i64: 2>, scalar_prefetch = 0 : i64, scratch_operands = 0 : i64, tpu.core_type = #tpu.core_type<tc>, window_params = [{transform_indices = @transform_0, window_bounds = array<i64: 16, 128>}, {transform_indices = @transform_1, window_bounds = array<i64: 16, 128>}]} {
    %c0 = arith.constant 0 : index
    %c0_0 = arith.constant 0 : index
    %0 = vector.load %arg1[%c0, %c0_0] : memref<16x128xf32, #tpu.memory_space<vmem>>, vector<16x128xf32>
    %cst = arith.constant 0.000000e+00 : f32
    %1 = vector.broadcast %cst : f32 to vector<7x128xf32>
    %2 = tpu.concatenate %1, %0 in 0 : vector<7x128xf32>, vector<16x128xf32> -> vector<23x128xf32>
    %cst_1 = arith.constant 0.000000e+00 : f32
    %3 = vector.broadcast %cst_1 : f32 to vector<23x7xf32>
    %4 = tpu.concatenate %2, %3 in 1 : vector<23x128xf32>, vector<23x7xf32> -> vector<23x135xf32>
    %5 = tpu.iota {dimensions = array<i32: 1>} : vector<16x128xi32>
    %c16_i32 = arith.constant 16 : i32
    %c0_i32 = arith.constant 0 : i32
    %6 = arith.cmpi eq, %c16_i32, %c0_i32 : i32
    %c1_i32 = arith.constant 1 : i32
    %7 = arith.select %6, %c1_i32, %c16_i32 : i32
    %8 = vector.broadcast %7 : i32 to vector<16x128xi32>
    %9 = arith.remsi %5, %8 : vector<16x128xi32>
    %c0_i32_2 = arith.constant 0 : i32
    %10 = vector.broadcast %c0_i32_2 : i32 to vector<16x128xi32>
    %11 = arith.cmpi ne, %9, %10 : vector<16x128xi32>
    %c0_i32_3 = arith.constant 0 : i32
    %12 = vector.broadcast %c0_i32_3 : i32 to vector<16x128xi32>
    %13 = arith.cmpi slt, %9, %12 : vector<16x128xi32>
    %c0_i32_4 = arith.constant 0 : i32
    %14 = arith.cmpi slt, %7, %c0_i32_4 : i32
    %15 = vector.broadcast %14 : i1 to vector<16x128xi1>
    %16 = vector.broadcast %15 : vector<16x128xi1> to vector<16x128xi1>
    %17 = arith.xori %13, %16 : vector<16x128xi1>
    %18 = arith.andi %17, %11 : vector<16x128xi1>
    %19 = vector.broadcast %7 : i32 to vector<16x128xi32>
    %20 = arith.addi %9, %19 : vector<16x128xi32>
    %21 = arith.select %18, %20, %9 : vector<16x128xi1>, vector<16x128xi32>
    %22 = vector.extract_strided_slice %4 {offsets = [0, 0], sizes = [23, 128], strides = [1, 1]} : vector<23x135xf32> to vector<23x128xf32>
    %23 = vector.extract_strided_slice %22 {offsets = [7, 0], sizes = [16, 128], strides = [1, 1]} : vector<23x128xf32> to vector<16x128xf32>
    %cst_5 = arith.constant 0.234835699 : f32
    %24 = vector.broadcast %cst_5 : f32 to vector<16x128xf32>
    %25 = arith.mulf %24, %23 : vector<16x128xf32>
    %26 = vector.extract_strided_slice %4 {offsets = [0, 1], sizes = [23, 128], strides = [1, 1]} : vector<23x135xf32> to vector<23x128xf32>
    %27 = vector.extract_strided_slice %26 {offsets = [6, 0], sizes = [16, 128], strides = [1, 1]} : vector<23x128xf32> to vector<16x128xf32>
    %cst_6 = arith.constant 0.410186797 : f32
    %28 = vector.broadcast %cst_6 : f32 to vector<16x128xf32>
    %29 = arith.mulf %28, %27 : vector<16x128xf32>
    %c15_i32 = arith.constant 15 : i32
    %30 = vector.broadcast %c15_i32 : i32 to vector<16x128xi32>
    %31 = arith.cmpi slt, %21, %30 : vector<16x128xi32>
    %cst_7 = arith.constant 0.000000e+00 : f32
    %32 = vector.broadcast %cst_7 : f32 to vector<16x128xf32>
    %33 = arith.select %31, %29, %32 : vector<16x128xi1>, vector<16x128xf32>
    %34 = arith.addf %25, %33 : vector<16x128xf32>
    %35 = vector.extract_strided_slice %4 {offsets = [0, 2], sizes = [23, 128], strides = [1, 1]} : vector<23x135xf32> to vector<23x128xf32>
    %36 = vector.extract_strided_slice %35 {offsets = [5, 0], sizes = [16, 128], strides = [1, 1]} : vector<23x128xf32> to vector<16x128xf32>
    %cst_8 = arith.constant 0.142435059 : f32
    %37 = vector.broadcast %cst_8 : f32 to vector<16x128xf32>
    %38 = arith.mulf %37, %36 : vector<16x128xf32>
    %c14_i32 = arith.constant 14 : i32
    %39 = vector.broadcast %c14_i32 : i32 to vector<16x128xi32>
    %40 = arith.cmpi slt, %21, %39 : vector<16x128xi32>
    %cst_9 = arith.constant 0.000000e+00 : f32
    %41 = vector.broadcast %cst_9 : f32 to vector<16x128xf32>
    %42 = arith.select %40, %38, %41 : vector<16x128xi1>, vector<16x128xf32>
    %43 = arith.addf %34, %42 : vector<16x128xf32>
    %44 = vector.extract_strided_slice %4 {offsets = [0, 3], sizes = [23, 128], strides = [1, 1]} : vector<23x135xf32> to vector<23x128xf32>
    %45 = vector.extract_strided_slice %44 {offsets = [4, 0], sizes = [16, 128], strides = [1, 1]} : vector<23x128xf32> to vector<16x128xf32>
    %cst_10 = arith.constant 0.096543841 : f32
    %46 = vector.broadcast %cst_10 : f32 to vector<16x128xf32>
    %47 = arith.mulf %46, %45 : vector<16x128xf32>
    %c13_i32 = arith.constant 13 : i32
    %48 = vector.broadcast %c13_i32 : i32 to vector<16x128xi32>
    %49 = arith.cmpi slt, %21, %48 : vector<16x128xi32>
    %cst_11 = arith.constant 0.000000e+00 : f32
    %50 = vector.broadcast %cst_11 : f32 to vector<16x128xf32>
    %51 = arith.select %49, %47, %50 : vector<16x128xi1>, vector<16x128xf32>
    %52 = arith.addf %43, %51 : vector<16x128xf32>
    %53 = vector.extract_strided_slice %4 {offsets = [0, 4], sizes = [23, 128], strides = [1, 1]} : vector<23x135xf32> to vector<23x128xf32>
    %54 = vector.extract_strided_slice %53 {offsets = [3, 0], sizes = [16, 128], strides = [1, 1]} : vector<23x128xf32> to vector<16x128xf32>
    %cst_12 = arith.constant 0.0317815579 : f32
    %55 = vector.broadcast %cst_12 : f32 to vector<16x128xf32>
    %56 = arith.mulf %55, %54 : vector<16x128xf32>
    %57 = vector.extract_strided_slice %53 {offsets = [4, 0], sizes = [16, 128], strides = [1, 1]} : vector<23x128xf32> to vector<16x128xf32>
    %cst_13 = arith.constant 0.0585568026 : f32
    %58 = vector.broadcast %cst_13 : f32 to vector<16x128xf32>
    %59 = arith.mulf %58, %57 : vector<16x128xf32>
    %60 = arith.addf %56, %59 : vector<16x128xf32>
    %c12_i32 = arith.constant 12 : i32
    %61 = vector.broadcast %c12_i32 : i32 to vector<16x128xi32>
    %62 = arith.cmpi slt, %21, %61 : vector<16x128xi32>
    %cst_14 = arith.constant 0.000000e+00 : f32
    %63 = vector.broadcast %cst_14 : f32 to vector<16x128xf32>
    %64 = arith.select %62, %60, %63 : vector<16x128xi1>, vector<16x128xf32>
    %65 = arith.addf %52, %64 : vector<16x128xf32>
    %66 = vector.extract_strided_slice %4 {offsets = [0, 5], sizes = [23, 128], strides = [1, 1]} : vector<23x135xf32> to vector<23x128xf32>
    %67 = vector.extract_strided_slice %66 {offsets = [2, 0], sizes = [16, 128], strides = [1, 1]} : vector<23x128xf32> to vector<16x128xf32>
    %cst_15 = arith.constant 0.0154354051 : f32
    %68 = vector.broadcast %cst_15 : f32 to vector<16x128xf32>
    %69 = arith.mulf %68, %67 : vector<16x128xf32>
    %c11_i32 = arith.constant 11 : i32
    %70 = vector.broadcast %c11_i32 : i32 to vector<16x128xi32>
    %71 = arith.cmpi slt, %21, %70 : vector<16x128xi32>
    %cst_16 = arith.constant 0.000000e+00 : f32
    %72 = vector.broadcast %cst_16 : f32 to vector<16x128xf32>
    %73 = arith.select %71, %69, %72 : vector<16x128xi1>, vector<16x128xf32>
    %74 = arith.addf %65, %73 : vector<16x128xf32>
    %75 = vector.extract_strided_slice %4 {offsets = [0, 6], sizes = [23, 128], strides = [1, 1]} : vector<23x135xf32> to vector<23x128xf32>
    %76 = vector.extract_strided_slice %75 {offsets = [1, 0], sizes = [16, 128], strides = [1, 1]} : vector<23x128xf32> to vector<16x128xf32>
    %cst_17 = arith.constant 0.00931698829 : f32
    %77 = vector.broadcast %cst_17 : f32 to vector<16x128xf32>
    %78 = arith.mulf %77, %76 : vector<16x128xf32>
    %c10_i32 = arith.constant 10 : i32
    %79 = vector.broadcast %c10_i32 : i32 to vector<16x128xi32>
    %80 = arith.cmpi slt, %21, %79 : vector<16x128xi32>
    %cst_18 = arith.constant 0.000000e+00 : f32
    %81 = vector.broadcast %cst_18 : f32 to vector<16x128xf32>
    %82 = arith.select %80, %78, %81 : vector<16x128xi1>, vector<16x128xf32>
    %83 = arith.addf %74, %82 : vector<16x128xf32>
    %84 = vector.extract_strided_slice %4 {offsets = [0, 7], sizes = [23, 128], strides = [1, 1]} : vector<23x135xf32> to vector<23x128xf32>
    %85 = vector.extract_strided_slice %84 {offsets = [0, 0], sizes = [16, 128], strides = [1, 1]} : vector<23x128xf32> to vector<16x128xf32>
    %cst_19 = arith.constant 9.07856098E-4 : f32
    %86 = vector.broadcast %cst_19 : f32 to vector<16x128xf32>
    %87 = arith.mulf %86, %85 : vector<16x128xf32>
    %c9_i32 = arith.constant 9 : i32
    %88 = vector.broadcast %c9_i32 : i32 to vector<16x128xi32>
    %89 = arith.cmpi slt, %21, %88 : vector<16x128xi32>
    %cst_20 = arith.constant 0.000000e+00 : f32
    %90 = vector.broadcast %cst_20 : f32 to vector<16x128xf32>
    %91 = arith.select %89, %87, %90 : vector<16x128xi1>, vector<16x128xf32>
    %92 = arith.addf %83, %91 : vector<16x128xf32>
    %c0_21 = arith.constant 0 : index
    %c0_22 = arith.constant 0 : index
    %93 = vector.load %arg2[%c0_21, %c0_22] : memref<16x128xf32, #tpu.memory_space<vmem>>, vector<16x128xf32>
    tpu.vector_store %arg2[%c0_21, %c0_22], %92 {strides = array<i32>} : memref<16x128xf32, #tpu.memory_space<vmem>>, vector<16x128xf32>,
    return
  }
  func.func @transform_0(%arg0: i32) -> (i32, i32) {
    %c0_i32 = arith.constant 0 : i32
    %c0_i32_0 = arith.constant 0 : i32
    return %c0_i32, %arg0 : i32, i32
  }
  func.func @transform_1(%arg0: i32) -> (i32, i32) {
    %c0_i32 = arith.constant 0 : i32
    %c0_i32_0 = arith.constant 0 : i32
    return %c0_i32, %arg0 : i32, i32
  }
}

</mosaic_0001>

<bundles_post_ra>
// kernel: motion_blur.1
= control target key start
LH: loop header
LB: loop body
LE: loop exit
PB: predicated region body
PF: predicated region fallthrough
CT: control target
= control target key end

     0   :  { %s664_s6 = smov 0   ;;  %s666_s7 = smov 0   ;;  %s830_s0 = inlined_call_operand.vmem [shape: f32[16,256], index: 0, kind: input, shape index: {}]   ;;  %s831_s1 = inlined_call_operand.vmem [shape: f32[16,256], index: 1, kind: output, shape index: {}]  }
   0x1   :  { %s668_s8 = smov 0  }
   0x2 LB: > { %s572_s9 = sadd.s32 4294967295, %s644_s8   ;;  %s681_s10 = sadd.s32 1, %s644_s8   ;;  %s644_s8 = sphi %s668_s8, %s835_s8   ;;  %s640_s7 = sphi %s666_s7, %s834_s7   ;;  %s636_s6 = sphi %s664_s6, %s833_s6  }
   0x3   : > { %s15_s11 = ssub.s32 %s644_s8, %s681_s10  ;;  %s18_s12 = sadd.s32 1, %s640_s7 }
   0x4   : > { %p16_p0 = scmp.eq.s32.totalorder %s15_s11, 0  ;;  %p25_p1 = scmp.ne.s32.totalorder %s640_s7, %s636_s6 }
   0x5   : > { %p26_p2 = scmp.eq.s32.totalorder %s644_s8, 0  ;;  %p55_p3 = scmp.eq.s32.totalorder %s572_s9, 1 }
   0x6   : > { %s692_s13 = scalar_select %p16_p0, %s640_s7, %s18_s12  }
   0x7   : > { %p27_p4 = por %p26_p2, %p25_p1  ;;  %p694_p5 = por %p55_p3, %p25_p1 }
   0x8   : > { %p575_p6 = scmp.ge.s32.totalorder %s644_s8, 2 }
   0xa   : > { %77 = sbr.rel (%p575_p6) target bundleno = 24 (0x18), region = 16 }
  0x11   : > { %80 = sbr.rel (!%p27_p4) target bundleno = 24 (0x18), region = 20  ;;  %s82_s15 = sand.u32 (%p27_p4), 1, %s640_s7  }
  0x12   : > { %s577_s16 = sshll.u32 (%p27_p4), %s644_s8, 3  ;;  %s576_s17 = sshll.u32 (%p27_p4), %s82_s15, 4 }
  0x13   : > { %s86_s20 = scalar_lea.vmem (%p27_p4), %s830_s0, %s577_s16  ;;  %s84_s21 = scalar_lea.vmem (%p27_p4), [#allocation2], %s576_s17 }
  0x14   : > { %v116_v0 = vld [vmem:[%s86_s20] sm:$0xff] (%p27_p4)  ;;  %v118_v1 = vld [vmem:[%s86_s20 + $0x10] sm:$0xff] (%p27_p4) }
  0x15   : > { %117 = vst [vmem:[%s84_s21] sm:$0xff] (%p27_p4), %v116_v0  ;;  %119 = vst [vmem:[%s84_s21 + $0x8] sm:$0xff] (%p27_p4), %v118_v1 }
  0x18 PF: > { %p578_p7 = scmp.ge.s32.totalorder %s644_s8, 1  ;;  %p124_p8 = scmp.lt.s32.totalorder %s644_s8, 3 }
  0x1a   : > { %p125_p9 = pnand %p578_p7, %p124_p8 }
  0x1b   : > { %v646_v2 = vmov (!%p125_p9), 0.0   ;;  %s131_s22 = sand.u32 (!%p125_p9), 1, %s636_s6   ;;  %s647_s24 = smov (!%p125_p9), 127   ;;  %vm153_vm0 = vcmask (!%p125_p9), 1046528   ;;  %vm186_vm1 = vcmask (!%p125_p9), 1041408   ;;  %vm225_vm2 = vcmask (!%p125_p9), 1042432  }
  0x1c   : > { %128 = sbr.rel (%p125_p9) target bundleno = 202 (0xca), region = 58  ;;  %v190_v3 = vrot.slane (!%p125_p9), %v646_v2, 6  ;;  %v268_v4 = vrot.slane (!%p125_p9), %v646_v2, 4  ;;  %s709_s23 = sshll.u32 (!%p125_p9), %s131_s22, 4  ;;  %v229_v5 = vrot.slane (!%p125_p9), %v646_v2, 5  ;;  %vm264_vm3 = vcmask (!%p125_p9), 1043456  }
  0x1d   : > { %s648_s25 = smov (!%p125_p9), 125   ;;  %s133_s26 = scalar_lea.vmem (!%p125_p9), [#allocation2], %s709_s23  ;;  %v308_v30 = vrot.slane (!%p125_p9), %v646_v2, 1  ;;  %vm328_vm4 = vcmask (!%p125_p9), 1044480   ;;  %vm371_vm5 = vcmask (!%p125_p9), 1045504   ;;  %vm200_vm6 = vcmask (!%p125_p9), 1039360  }
  0x1e   : > { %196 = vrot.lane.b32.xlu0 (!%p125_p9), %v190_v3, %s647_s24  ;;  %274 = vrot.lane.b32.xlu1 (!%p125_p9), %v268_v4, %s648_s25  ;;  %v149_v6 = vld [vmem:[%s133_s26] sm:$0xff] (!%p125_p9)  ;;  %v150_v7 = vld [vmem:[%s133_s26 + $0x8] sm:$0xff] (!%p125_p9)  ;;  %s649_s27 = smov (!%p125_p9), 126   ;;  %s650_s28 = smov (!%p125_p9), 124   ;;  %v375_v4 = vrot.slane (!%p125_p9), %v646_v2, 2  ;;  %vm239_vm8 = vcmask (!%p125_p9), 1031168  }
  0x1f   : > { %v154_v8 = vrot.slane (!%p125_p9), %v149_v6, 1  ;;  %v715_v9 = vrot.slane (!%p125_p9), %v150_v7, 1  ;;  %v332_v46 = vrot.slane (!%p125_p9), %v308_v30, 3  ;;  %s651_s29 = smov (!%p125_p9), 123   ;;  %s652_s30 = smov (!%p125_p9), 122   ;;  %vm278_vm10 = vcmask (!%p125_p9), 1022976  }
  0x20   : > { %s653_s2 = smov (!%p125_p9), 121   ;;  %vm346_vm11 = vcmask (!%p125_p9), 1014784   ;;  %vm385_vm13 = vcmask (!%p125_p9), 1006592   ;;  %s148_s3 = scalar_lea.vmem (!%p125_p9), [#allocation3], %s709_s23 }
  0x21   : > { %v720_v10 = vsel (!%p125_p9), %vm153_vm0, %v154_v8, %v715_v9  ;;  %v180_v11 = vmul.f32 (!%p125_p9), 0.4101868, %v715_v9  ;;  %v724_v12 = vsel (!%p125_p9), %vm153_vm0, 0.0, %v154_v8  ;;  %v220_v13 = vmul.f32 (!%p125_p9), 0.14243506, %v715_v9 }
  0x22   : > { %235 = vrot.lane.b32.xlu0 (!%p125_p9), %v229_v5, %s649_s27  ;;  %v179_v14 = vmul.f32 (!%p125_p9), 0.4101868, %v720_v10  ;;  %v178_v15 = vmul.f32 (!%p125_p9), 0.4101868, %v724_v12  ;;  %v218_v16 = vmul.f32 (!%p125_p9), 0.14243506, %v724_v12  ;;  %v617_v56 = vpack.i.bf16 (!%p125_p9), %v332_v46, %v332_v46 }
  0x23   : > { %v192_v17 = vrot.slane %v180_v11, 6  ;;  %v219_v18 = vmul.f32 0.14243506, %v720_v10  ;;  %v257_v19 = vmul.f32 0.09654384, %v724_v12  ;;  %v231_v32 = vrot.slane %v220_v13, 5 }
  0x24   : > { %v188_v20 = vrot.slane %v179_v14, 6  ;;  %v187_v21 = vrot.slane %v178_v15, 6  ;;  %v226_v22 = vrot.slane %v218_v16, 5  ;;  %v258_v23 = vmul.f32 0.09654384, %v720_v10  ;;  %s582_s4 = sshll.u32 (%p694_p5), %s572_s9, 3 }
  0x25   : > { %v227_v24 = vrot.slane %v219_v18, 5  ;;  %v265_v25 = vrot.slane %v257_v19, 4  ;;  %v259_v26 = vmul.f32 0.09654384, %v715_v9  ;;  %v299_v34 = vmul.f32 0.058556803, %v724_v12  ;;  %s479_s11 = scalar_lea.vmem (%p694_p5), %s831_s1, %s582_s4 }
  0x26   : > { %v193_v27 = vsel %vm186_vm1, %v188_v20, %v192_v17  ;;  %v189_v28 = vsel %vm186_vm1, %v187_v21, %v188_v20  ;;  %v266_v29 = vrot.slane %v258_v23, 4  ;;  %v300_v36 = vmul.f32 0.058556803, %v720_v10 }
  0x27   : > { %198 = vrot.lane.b32.xlu1 %v193_v27, %s647_s24  ;;  %194 = vrot.lane.b32.xlu0 %v189_v28, %s647_s24  ;;  %v228_v31 = vsel %vm225_vm2, %v226_v22, %v227_v24  ;;  %v270_v33 = vrot.slane %v259_v26, 4  ;;  %v301_v37 = vmul.f32 0.058556803, %v715_v9  ;;  %v298_v38 = vmul.f32 0.031781558, %v715_v9 }
  0x28   : > { %v267_v35 = vsel %vm264_vm3, %v265_v25, %v266_v29  ;;  %v296_v39 = vmul.f32 0.031781558, %v724_v12  ;;  %v297_v40 = vmul.f32 0.031781558, %v720_v10  ;;  %v305_v41 = vrot.slane %v299_v34, 1 }
  0x29   : > { %v306_v42 = vrot.slane %v300_v36, 1  ;;  %v310_v43 = vrot.slane %v301_v37, 1  ;;  %v232_v44 = vsel %vm225_vm2, %v227_v24, %v231_v32  ;;  %v271_v45 = vsel %vm264_vm3, %v266_v29, %v270_v33 }
  0x2a   : > { %v364_v47 = vmul.f32 0.015435405, %v724_v12  ;;  %v365_v51 = vmul.f32 0.015435405, %v720_v10  ;;  %v366_v60 = vmul.f32 0.015435405, %v715_v9  ;;  %v161_v20 = vlaneseq }
  0x2b   : > { %233 = vrot.lane.b32.xlu1 %v228_v31, %s649_s27  ;;  %272 = vrot.lane.b32.xlu0 %v267_v35, %s648_s25  ;;  %v307_v48 = vsel %vm153_vm0, %v305_v41, %v306_v42  ;;  %v311_v49 = vsel %vm153_vm0, %v306_v42, %v310_v43  ;;  %v320_v50 = vadd.f32 %v310_v43, %v298_v38  ;;  %v403_v62 = vmul.f32 0.009316988, %v724_v12 }
  0x2c   : > { %v317_v52 = vadd.f32 %v307_v48, %v296_v39  ;;  %v319_v53 = vadd.f32 %v311_v49, %v297_v40  ;;  %v372_v58 = vrot.slane %v364_v47, 2  ;;  %v373_v59 = vrot.slane %v365_v51, 2 }
  0x2d   : > { %v334_v57 = vrot.slane %v320_v50, 3  ;;  %v377_v1 = vrot.slane %v366_v60, 2  ;;  %v404_v3 = vmul.f32 0.009316988, %v720_v10  ;;  %v410_v6 = vrot.slane %v403_v62, 1 }
  0x2e   : > { %v329_v54 = vrot.slane %v317_v52, 3  ;;  %v330_v55 = vrot.slane %v319_v53, 3  ;;  %v374_v0 = vsel %vm371_vm5, %v372_v58, %v373_v59  ;;  %v405_v8 = vmul.f32 0.009316988, %v715_v9 }
  0x2f   : > { %237 = vrot.lane.b32.xlu1 %v232_v44, %s649_s27  ;;  %276 = vrot.lane.b32.xlu0 %v271_v45, %s648_s25  ;;  %v378_v5 = vsel %vm371_vm5, %v373_v59, %v377_v1  ;;  %v411_v7 = vrot.slane %v404_v3, 1  ;;  %v439_v14 = vmul.f32 0.0009078561, %v724_v12  ;;  %v440_v16 = vmul.f32 0.0009078561, %v720_v10 }
  0x30   : > { %v331_v61 = vsel %vm328_vm4, %v329_v54, %v330_v55  ;;  %v335_v63 = vsel %vm328_vm4, %v330_v55, %v334_v57  ;;  %v413_v13 = vrot.slane %v405_v8, 1  ;;  %v162_v23 = vand.u32 127, %v161_v20 }
  0x31   : > { %v412_v11 = vsel %vm153_vm0, %v410_v6, %v411_v7  ;;  %v177_v36 = vmul.f32 0.2348357, %v715_v9  ;;  %v175_v45 = vmul.f32 0.2348357, %v724_v12  ;;  %v176_v46 = vmul.f32 0.2348357, %v720_v10 }
  0x32   : > { %v414_v15 = vsel %vm153_vm0, %v411_v7, %v413_v13  ;;  %v769_v26 = vand.u32 15, %v162_v23  ;;  %vm421_vm2 = vcmask 998400   ;;  %vm450_vm3 = vcmask 990208  }
  0x33   : > { %338 = vrot.lane.b32.xlu1 %v331_v61, %s650_s28  ;;  %618 = vrot.lane.b32.xlu0 %v617_v56, %s650_s28 }
  0x34   : > { %vm181_vm7 = vcmp.lt.s32.totalorder %v769_v26, 15  ;;  %vm221_vm9 = vcmp.lt.s32.totalorder %v769_v26, 14  ;;  %vm260_vm12 = vcmp.lt.s32.totalorder %v769_v26, 13  ;;  %vm322_vm14 = vcmp.lt.s32.totalorder %v769_v26, 12 }
  0x35   : > { %vm367_vm15 = vcmp.lt.s32.totalorder %v769_v26, 11  ;;  %vm406_vm1 = vcmp.lt.s32.totalorder %v769_v26, 10  ;;  %vm441_vm4 = vcmp.lt.s32.totalorder %v769_v26, 9 }
  0x37   : > { %342 = vrot.lane.b32.xlu1 %v335_v63, %s650_s28  ;;  %379 = vrot.lane.b32.xlu0 %v374_v0, %s651_s29 }
  0x3b   : > { %381 = vrot.lane.b32.xlu1 %v375_v4, %s651_s29  ;;  %383 = vrot.lane.b32.xlu0 %v378_v5, %s651_s29 }
  0x3f   : > { %415 = vrot.lane.b32.xlu1 %v412_v11, %s652_s30  ;;  %417 = vrot.lane.b32.xlu0 %v308_v30, %s652_s30 }
  0x43   : > { %419 = vrot.lane.b32.xlu1 %v414_v15, %s652_s30  ;;  %444 = vrot.lane.b32.xlu0 %v439_v14, %s653_s2 }
  0x47   : > { %446 = vrot.lane.b32.xlu1 %v646_v2, %s653_s2  ;;  %448 = vrot.lane.b32.xlu0 %v440_v16, %s653_s2 }
  0x90   : > { %v197_v17 = vpop.permute.xlu0 %196  ;;  %v275_v18 = vpop.permute.xlu1 %274 }
  0x94   : > { %v236_v19 = vpop.permute.xlu0 %235 }
  0x99   : > { %v199_v21 = vpop.permute.xlu1 %198  ;;  %v195_v22 = vpop.permute.xlu0 %194 }
  0x9a   : > { %v202_v29 = vsel %vm200_vm6, %v199_v21, %v197_v17  ;;  %v201_v30 = vsel %vm200_vm6, %v195_v22, %v197_v17 }
  0x9b   : > { %v206_v33 = vsel %vm181_vm7, %v202_v29, 0.0  ;;  %v205_v34 = vsel %vm181_vm7, %v201_v30, 0.0 }
  0x9c   : > { %v210_v41 = vrot.slane %v206_v33, 1  ;;  %v209_v42 = vrot.slane %v205_v34, 1 }
  0x9d   : > { %v234_v24 = vpop.permute.xlu1 %233  ;;  %v273_v25 = vpop.permute.xlu0 %272 }
  0x9e   : > { %v240_v35 = vsel %vm239_vm8, %v234_v24, %v236_v19  ;;  %v279_v50 = vsel %vm278_vm10, %v273_v25, %v275_v18  ;;  %v211_v10 = vsel %vm153_vm0, %v209_v42, %v210_v41  ;;  %v215_v55 = vadd.f32 %v209_v42, %v175_v45 }
  0x9f   : > { %v244_v43 = vsel %vm221_vm9, %v240_v35, 0.0  ;;  %v217_v58 = vadd.f32 %v210_v41, %v177_v36  ;;  %v283_v59 = vsel %vm260_vm12, %v279_v50, 0.0  ;;  %v216_v62 = vadd.f32 %v211_v10, %v176_v46 }
  0xa0   : > { %v248_v49 = vrot.slane %v244_v43, 1  ;;  %v287_v11 = vrot.slane %v283_v59, 1 }
  0xa1   : > { %v238_v27 = vpop.permute.xlu1 %237  ;;  %v277_v28 = vpop.permute.xlu0 %276 }
  0xa2   : > { %v241_v32 = vsel %vm239_vm8, %v238_v27, %v236_v19  ;;  %v280_v48 = vsel %vm278_vm10, %v277_v28, %v275_v18  ;;  %v254_v63 = vadd.f32 %v248_v49, %v215_v55 }
  0xa3   : > { %v245_v37 = vsel %vm221_vm9, %v241_v32, 0.0  ;;  %v284_v56 = vsel %vm260_vm12, %v280_v48, 0.0 }
  0xa4   : > { %v249_v47 = vrot.slane %v245_v37, 1  ;;  %v288_v6 = vrot.slane %v284_v56, 1  ;;  %v293_v17 = vadd.f32 %v287_v11, %v254_v63 }
  0xa5   : > { %v339_v2 = vpop.permute.xlu1 %338  ;;  %v619_v31 = vpop.permute.xlu0 %618 }
  0xa6   : > { %v620_v38 = vunpack.i.l.bf16 %v619_v31  ;;  %v621_v44 = vunpack.i.h.bf16 %v619_v31  ;;  %v250_v60 = vsel %vm153_vm0, %v248_v49, %v249_v47  ;;  %v256_v5 = vadd.f32 %v249_v47, %v217_v58 }
  0xa7   : > { %v255_v13 = vadd.f32 %v250_v60, %v216_v62  ;;  %v289_v21 = vsel %vm153_vm0, %v287_v11, %v288_v6 }
  0xa8   : > { %v347_v51 = vsel %vm346_vm11, %v339_v2, %v620_v38  ;;  %v295_v22 = vadd.f32 %v288_v6, %v256_v5 }
  0xa9   : > { %v343_v39 = vpop.permute.xlu1 %342  ;;  %v380_v40 = vpop.permute.xlu0 %379  ;;  %v351_v61 = vsel %vm322_vm14, %v347_v51, 0.0  ;;  %v294_v25 = vadd.f32 %v289_v21, %v255_v13 }
  0xaa   : > { %v348_v9 = vsel %vm346_vm11, %v343_v39, %v621_v44  ;;  %v355_v14 = vrot.slane %v351_v61, 1 }
  0xab   : > { %v352_v57 = vsel %vm322_vm14, %v348_v9, 0.0 }
  0xac   : > { %v356_v7 = vrot.slane %v352_v57, 1  ;;  %v361_v27 = vadd.f32 %v355_v14, %v293_v17 }
  0xad   : > { %v382_v12 = vpop.permute.xlu1 %381  ;;  %v384_v52 = vpop.permute.xlu0 %383 }
  0xae   : > { %v386_v53 = vsel %vm385_vm13, %v380_v40, %v382_v12  ;;  %v387_v54 = vsel %vm385_vm13, %v384_v52, %v382_v12  ;;  %v357_v23 = vsel %vm153_vm0, %v355_v14, %v356_v7  ;;  %v363_v29 = vadd.f32 %v356_v7, %v295_v22 }
  0xaf   : > { %v390_v0 = vsel %vm367_vm15, %v386_v53, 0.0  ;;  %v391_v1 = vsel %vm367_vm15, %v387_v54, 0.0  ;;  %v362_v32 = vadd.f32 %v357_v23, %v294_v25 }
  0xb0   : > { %v394_v15 = vrot.slane %v390_v0, 1  ;;  %v395_v16 = vrot.slane %v391_v1, 1 }
  0xb1   : > { %v416_v3 = vpop.permute.xlu1 %415  ;;  %v418_v4 = vpop.permute.xlu0 %417 }
  0xb2   : > { %v422_v8 = vsel %vm421_vm2, %v416_v3, %v418_v4  ;;  %v396_v30 = vsel %vm153_vm0, %v394_v15, %v395_v16  ;;  %v400_v33 = vadd.f32 %v394_v15, %v361_v27  ;;  %v402_v36 = vadd.f32 %v395_v16, %v363_v29 }
  0xb3   : > { %v426_v18 = vsel %vm406_vm1, %v422_v8, 0.0  ;;  %v401_v40 = vadd.f32 %v396_v30, %v362_v32 }
  0xb4   : > { %v430_v2 = vrot.slane %v426_v18, 1 }
  0xb5   : > { %v420_v19 = vpop.permute.xlu1 %419  ;;  %v445_v20 = vpop.permute.xlu0 %444 }
  0xb6   : > { %v423_v24 = vsel %vm421_vm2, %v420_v19, %v418_v4  ;;  %v436_v42 = vadd.f32 %v430_v2, %v400_v33 }
  0xb7   : > { %v427_v28 = vsel %vm406_vm1, %v423_v24, 0.0 }
  0xb8   : > { %v431_v31 = vrot.slane %v427_v28, 1 }
  0xb9   : > { %v447_v34 = vpop.permute.xlu1 %446  ;;  %v449_v35 = vpop.permute.xlu0 %448 }
  0xba   : > { %v432_v37 = vsel %vm153_vm0, %v430_v2, %v431_v31  ;;  %v451_v38 = vsel %vm450_vm3, %v445_v20, %v447_v34  ;;  %v452_v39 = vsel %vm450_vm3, %v449_v35, %v447_v34  ;;  %v438_v43 = vadd.f32 %v431_v31, %v402_v36 }
  0xbb   : > { %v455_v41 = vsel %vm441_vm4, %v451_v38, 0.0  ;;  %v456_v26 = vsel %vm441_vm4, %v452_v39, 0.0  ;;  %v437_v46 = vadd.f32 %v432_v37, %v401_v40  ;;  %477 = sbr.rel (!%p694_p5) target bundleno = 202 (0xca), region = 66 }
  0xbc   : > { %v459_v44 = vrot.slane %v455_v41, 1  ;;  %v460_v45 = vrot.slane %v456_v26, 1 }
  0xbe   : > { %v465_v47 = vadd.f32 %v459_v44, %v436_v42  ;;  %v461_v48 = vsel %vm153_vm0, %v459_v44, %v460_v45  ;;  %v467_v9 = vadd.f32 %v460_v45, %v438_v43 }
  0xbf   : > { %v466_v49 = vadd.f32 %v461_v48, %v437_v46 }
  0xc0   : > { %468 = vst [vmem:[%s148_s3 - $0x7] sm:$0x80] %v465_v47  ;;  %470 = vst [vmem:[%s148_s3 + $0x9] sm:$0x7f] %v467_v9 }
  0xc1   : > { %469 = vst [vmem:[%s148_s3 + $0x1] sm:$0xff] %v466_v49 }
  0xc8   : > { %v509_v50 = vld [vmem:[%s148_s3] sm:$0xff]  ;;  %v511_v51 = vld [vmem:[%s148_s3 + $0x8] sm:$0xff] }
  0xc9   : > { %510 = vst [vmem:[%s479_s11] sm:$0xff] %v509_v50  ;;  %512 = vst [vmem:[%s479_s11 + $0x10] sm:$0xff] %v511_v51 }
  0xca PF: > { %p8_p10 = scmp.ge.s32.totalorder %s681_s10, 4   ;;  %s833_s6 = smov %s640_s7 }
  0xcb   : > { %s834_s7 = smov %s692_s13  ;;  %s835_s8 = smov %s681_s10 }
  0xcc   :  { %10 = sbr.rel (!%p8_p10) target bundleno = 2 (0x2), region = 135 }

</bundles_post_ra>
